<compile_context>
chip_gen: v5e
topology: v5e:2x2
jax: 0.10.0
libtpu: 0.0.40
codegen_flags: <defaults>
</compile_context>

<pallas_src>
import functools

import jax
import jax.numpy as jnp
from jax import lax
from jax.experimental import pallas as pl
from jax.experimental.pallas import tpu as pltpu


# -----------------------------------------------------------------------------
# helpers
# -----------------------------------------------------------------------------
def _round_up(x, m):
    return ((x + m - 1) // m) * m


def _pick_tn(hid, budget_bytes=8 * 1024 * 1024):
    """Column-block width for streaming w2 through VMEM (double-buffered bf16)."""
    if hid % 128 != 0:
        return hid  # irregular / tiny hidden size: single whole-array block
    tn = 128
    while (hid % (tn * 2) == 0) and (hid * (tn * 2) * 2 * 2 <= budget_bytes):
        tn *= 2
    return tn


# -----------------------------------------------------------------------------
# Pallas kernel
# -----------------------------------------------------------------------------
def _translator_kernel(x_ref, w1_ref, b1_ref, w2_ref, b2_ref, wh_ref, bh_ref,
                       out_ref, h1_ref, acc_ref, *, tn, zl_out, z_thresh, with_gmm):
    k = pl.program_id(0)
    num_k = pl.num_programs(0)

    # --- step 0: h1 = relu(x @ w1 + b1) (VMEM-resident bf16 across the grid),
    #     and fold the h1 head contribution + head bias into the accumulator.
    @pl.when(k == 0)
    def _init():
        h1 = jnp.dot(x_ref[...], w1_ref[...], preferred_element_type=jnp.float32)
        h1 = jnp.maximum(h1 + b1_ref[...], 0.0)
        h1b = h1.astype(jnp.bfloat16)
        h1_ref[...] = h1b
        acc_ref[...] = (jnp.dot(h1b, wh_ref[...],
                                preferred_element_type=jnp.float32)
                        + bh_ref[...])

    h1_bf = h1_ref[...]                                 # (B, hid) bf16

    # --- current column block of h2 = relu(h1 @ w2 + b2)
    h2_blk = jnp.dot(h1_bf, w2_ref[...], preferred_element_type=jnp.float32)
    h2_blk = jnp.maximum(h2_blk + b2_ref[...], 0.0)     # (B, tn) f32

    # --- accumulate this block's contribution to the fused head:
    #     acc += h2_blk @ wh[k*tn:(k+1)*tn, :]           (sublane-dim dynamic slice)
    start = pl.multiple_of(k * tn, tn)
    wh_blk = wh_ref[pl.ds(start, tn), :]                # (tn, head_pad) bf16
    acc_ref[...] += jnp.dot(h2_blk.astype(jnp.bfloat16), wh_blk,
                            preferred_element_type=jnp.float32)

    # --- last step: apply tanh*thresh on the z lanes only and store (lane-dense)
    @pl.when(k == num_k - 1)
    def _finalize():
        head = acc_ref[...]
        if z_thresh is not None:
            zed = z_thresh * jnp.tanh(head)
            if with_gmm:
                # tanh*thresh applies only to the z_layer lanes, not the logits lanes
                col = lax.broadcasted_iota(jnp.int32, head.shape, 1)
                head = jnp.where(col < zl_out, zed, head)
            else:
                head = zed  # padded lanes are sliced away in the wrapper
        out_ref[...] = head.astype(out_ref.dtype)


# -----------------------------------------------------------------------------
# Wrapper
# -----------------------------------------------------------------------------
def translator_forward(params, x, *, z_thresh, with_gmm=False, num_mixtures=None,
                       min_std=1e-6, no_sample=True, tn=None):
    """Translator forward pass.

    Non-GMM: returns z of shape (B, z_dim).
    GMM + no_sample=True: returns (z_mixture_logits, z_means).
    GMM + no_sample=False: returns ((logits, means, stds), z) where z is the
      argmax-selected component mean (deterministic `else` branch of the torch code).
    """
    w1 = params["w1"]
    w2 = params["w2"]
    wz = params["wz"]
    clip_dim, hid = w1.shape          # derive all spec shapes from the params
    zl_out = wz.shape[1]
    B = x.shape[0]

    if with_gmm:
        nm = num_mixtures if num_mixtures is not None else params["wm"].shape[1]
        wh = jnp.concatenate([wz, params["wm"]], axis=1)
        bh = jnp.concatenate([params["bz"], params["bm"]], axis=1)
        head_out = zl_out + nm
    else:
        nm = 0
        wh = wz
        bh = params["bz"]
        head_out = zl_out

    # lane-dense fused head: pad output width to a multiple of 128
    head_pad = max(_round_up(head_out, 128), 128)
    if head_pad != head_out:
        wh = jnp.pad(wh, ((0, 0), (0, head_pad - head_out)))
        bh = jnp.pad(bh, ((0, 0), (0, head_pad - head_out)))

    if tn is None:
        tn = _pick_tn(hid)
    assert hid % tn == 0
    num_k = hid // tn

    # bf16 weights / activations, f32 accumulation on the MXU
    xb = x.astype(jnp.bfloat16)
    w1b = w1.astype(jnp.bfloat16)
    w2b = w2.astype(jnp.bfloat16)
    whb = wh.astype(jnp.bfloat16)
    b1 = params["b1"].astype(jnp.float32)
    b2 = params["b2"].astype(jnp.float32)
    bhf = bh.astype(jnp.float32)

    # VMEM budget from the actual tiles (x2 for double buffering of pipelined blocks)
    est = (2 * (B * clip_dim * 2            # x
                + clip_dim * hid * 2        # w1
                + hid * 4                   # b1
                + hid * tn * 2              # streamed w2 block
                + tn * 4                    # streamed b2 block
                + head_pad * 4              # bh
                + B * head_pad * 4)         # output block
           + hid * head_pad * 2             # resident fused head weight
           + B * hid * 2 + B * head_pad * 4)  # scratch (h1 bf16, acc f32)
    vmem_limit = int(min(64 * 1024 * 1024, max(32 * 1024 * 1024, 2 * est)))

    kernel = functools.partial(_translator_kernel, tn=tn, zl_out=zl_out,
                               z_thresh=z_thresh, with_gmm=with_gmm)

    out = pl.pallas_call(
        kernel,
        out_shape=jax.ShapeDtypeStruct((B, head_pad), jnp.float32),
        grid=(num_k,),
        in_specs=[
            pl.BlockSpec((B, clip_dim), lambda k: (0, 0)),      # x        (resident)
            pl.BlockSpec((clip_dim, hid), lambda k: (0, 0)),    # w1       (resident)
            pl.BlockSpec((1, hid), lambda k: (0, 0)),           # b1       (resident)
            pl.BlockSpec((hid, tn), lambda k: (0, k)),          # w2       (streamed)
            pl.BlockSpec((1, tn), lambda k: (0, k)),            # b2       (streamed)
            pl.BlockSpec((hid, head_pad), lambda k: (0, 0)),    # fused wz|wm (resident)
            pl.BlockSpec((1, head_pad), lambda k: (0, 0)),      # fused bz|bm (resident)
        ],
        out_specs=pl.BlockSpec((B, head_pad), lambda k: (0, 0)),
        scratch_shapes=[
            pltpu.VMEM((B, hid), jnp.bfloat16),       # h1 (resident activation)
            pltpu.VMEM((B, head_pad), jnp.float32),   # fused head accumulator
        ],
        compiler_params=pltpu.CompilerParams(
            # the grid axis carries the head accumulation -> must be "arbitrary"
            dimension_semantics=("arbitrary",),
            vmem_limit_bytes=vmem_limit,
        ),
    )(xb, w1b, b1, w2b, b2, whb, bhf)

    if not with_gmm:
        return out[:, :zl_out]

    z_flat = out[:, :zl_out]
    z_mixture_logits = out[:, zl_out:zl_out + nm]
    z_dim = zl_out // nm
    z_means = z_flat.reshape(B, nm, z_dim)
    z_stds = jnp.broadcast_to(jnp.exp(params["z_log_stds"]) + min_std, (B, nm, z_dim))
    if no_sample:
        return z_mixture_logits, z_means
    # TODO(synk): torch.distributions.MixtureSameFamily / Gumbel-softmax reparam
    # sampling paths have no Pallas equivalent; return GMM params + argmax component.
    z_index = jnp.argmax(z_mixture_logits, axis=1)
    z = jnp.take_along_axis(z_means, z_index[:, None, None], axis=1)[:, 0, :]
    return (z_mixture_logits, z_means, z_stds), z


# -----------------------------------------------------------------------------
# Deterministic parameter construction
# -----------------------------------------------------------------------------
def make_params(key, clip_dim, z_dim, with_gmm=False, num_mixtures=None):
    hid = 4 * clip_dim
    zl_out = num_mixtures * z_dim if with_gmm else z_dim
    ks = jax.random.split(key, 8)
    scale = 0.05
    params = {
        "w1": scale * jax.random.normal(ks[0], (clip_dim, hid), jnp.float32),
        "b1": scale * jax.random.normal(ks[1], (1, hid), jnp.float32),
        "w2": scale * jax.random.normal(ks[2], (hid, hid), jnp.float32),
        "b2": scale * jax.random.normal(ks[3], (1, hid), jnp.float32),
        "wz": scale * jax.random.normal(ks[4], (hid, zl_out), jnp.float32),
        "bz": scale * jax.random.normal(ks[5], (1, zl_out), jnp.float32),
    }
    if with_gmm:
        params["wm"] = scale * jax.random.normal(ks[6], (hid, num_mixtures), jnp.float32)
        params["bm"] = scale * jax.random.normal(ks[7], (1, num_mixtures), jnp.float32)
        params["z_log_stds"] = jnp.log(jnp.ones((1, 1, z_dim), jnp.float32) * 0.01)
    return params


# -----------------------------------------------------------------------------
# Pure-JAX reference (mirrors the kernel's bf16-inputs / f32-accumulate numerics)
# -----------------------------------------------------------------------------
def reference_forward(params, x, z_thresh, with_gmm=False):
    bf, f32 = jnp.bfloat16, jnp.float32
    h1 = jnp.maximum(
        jnp.dot(x.astype(bf), params["w1"].astype(bf), preferred_element_type=f32)
        + params["b1"], 0.0)
    h2 = jnp.maximum(
        jnp.dot(h1.astype(bf), params["w2"].astype(bf), preferred_element_type=f32)
        + params["b2"], 0.0)
    h = h1 + h2
    z = jnp.dot(h.astype(bf), params["wz"].astype(bf), preferred_element_type=f32) \
        + params["bz"]
    if z_thresh is not None:
        z = z_thresh * jnp.tanh(z)
    if with_gmm:
        logits = jnp.dot(h.astype(bf), params["wm"].astype(bf),
                         preferred_element_type=f32) + params["bm"]
        return z, logits
    return z


if __name__ == "__main__":
    key = jax.random.PRNGKey(0)
    kx, kp1, kp2 = jax.random.split(key, 3)

    B, clip_dim, z_dim = 8, 64, 32
    z_thresh = 2.0
    x = jax.random.normal(kx, (B, clip_dim), jnp.float32)

    # Force tn=128 (hid=256 -> num_k=2) so the streamed / accumulated path is exercised.
    TN = 128

    # ---- non-GMM path ----
    params = make_params(kp1, clip_dim, z_dim, with_gmm=False)
    z = jax.block_until_ready(
        translator_forward(params, x, z_thresh=z_thresh, tn=TN))
    z_ref = reference_forward(params, x, z_thresh)
    assert z.shape == (B, z_dim)
    assert jnp.allclose(z, z_ref, atol=2e-2, rtol=2e-2), \
        float(jnp.max(jnp.abs(z - z_ref)))

    # ---- GMM path, no_sample=True ----
    num_mixtures = 4
    gparams = make_params(kp2, clip_dim, z_dim, with_gmm=True, num_mixtures=num_mixtures)
    logits, means = translator_forward(
        gparams, x, z_thresh=z_thresh, with_gmm=True,
        num_mixtures=num_mixtures, no_sample=True, tn=TN)
    logits = jax.block_until_ready(logits)
    means = jax.block_until_ready(means)
    assert logits.shape == (B, num_mixtures)
    assert means.shape == (B, num_mixtures, z_dim)

    z_ref_g, logits_ref = reference_forward(gparams, x, z_thresh, with_gmm=True)
    assert jnp.allclose(logits, logits_ref, atol=2e-2, rtol=2e-2), \
        float(jnp.max(jnp.abs(logits - logits_ref)))
    assert jnp.allclose(means, z_ref_g.reshape(B, num_mixtures, z_dim),
                        atol=2e-2, rtol=2e-2), \
        float(jnp.max(jnp.abs(means - z_ref_g.reshape(B, num_mixtures, z_dim))))

    # ---- GMM path, default (argmax component select) ----
    gmm_params, z_sel = translator_forward(
        gparams, x, z_thresh=z_thresh, with_gmm=True,
        num_mixtures=num_mixtures, no_sample=False, tn=TN)
    z_sel = jax.block_until_ready(z_sel)
    assert z_sel.shape == (B, z_dim)

    print("KERNEL_OK")
</pallas_src>

<mosaic_0001>
module attributes {stable_mosaic.version = 11 : i64} {
  func.func @_translator_kernel(%arg0: i32, %arg1: memref<8x64xbf16, #tpu.memory_space<vmem>>, %arg2: memref<64x256xbf16, #tpu.memory_space<vmem>>, %arg3: memref<1x256xf32, #tpu.memory_space<vmem>>, %arg4: memref<256x128xbf16, #tpu.memory_space<vmem>>, %arg5: memref<1x128xf32, #tpu.memory_space<vmem>>, %arg6: memref<256x128xbf16, #tpu.memory_space<vmem>>, %arg7: memref<1x128xf32, #tpu.memory_space<vmem>>, %arg8: memref<8x128xf32, #tpu.memory_space<vmem>>, %arg9: memref<8x256xbf16, #tpu.memory_space<vmem>>, %arg10: memref<8x128xf32, #tpu.memory_space<vmem>>) attributes {dimension_semantics = [#tpu.dimension_semantics<arbitrary>], iteration_bounds = array<i64: 2>, scalar_prefetch = 0 : i64, scratch_operands = 2 : i64, tpu.core_type = #tpu.core_type<tc>, window_params = [{pipeline_mode = #tpu.pipeline_mode<synchronous>, transform_indices = @transform_0, window_bounds = array<i64: 8, 64>}, {pipeline_mode = #tpu.pipeline_mode<synchronous>, transform_indices = @transform_1, window_bounds = array<i64: 64, 256>}, {pipeline_mode = #tpu.pipeline_mode<synchronous>, transform_indices = @transform_2, window_bounds = array<i64: 1, 256>}, {transform_indices = @transform_3, window_bounds = array<i64: 256, 128>}, {transform_indices = @transform_4, window_bounds = array<i64: 1, 128>}, {pipeline_mode = #tpu.pipeline_mode<synchronous>, transform_indices = @transform_5, window_bounds = array<i64: 256, 128>}, {pipeline_mode = #tpu.pipeline_mode<synchronous>, transform_indices = @transform_6, window_bounds = array<i64: 1, 128>}, {pipeline_mode = #tpu.pipeline_mode<synchronous>, transform_indices = @transform_7, window_bounds = array<i64: 8, 128>}]} {
    %c0_i32 = arith.constant 0 : i32
    %0 = arith.cmpi eq, %arg0, %c0_i32 : i32
    %1 = arith.extui %0 : i1 to i32
    %c0_i32_0 = arith.constant 0 : i32
    %2 = arith.cmpi ne, %1, %c0_i32_0 : i32
    scf.if %2 {
      %c0_14 = arith.constant 0 : index
      %c0_15 = arith.constant 0 : index
      %23 = vector.load %arg1[%c0_14, %c0_15] : memref<8x64xbf16, #tpu.memory_space<vmem>>, vector<8x64xbf16>
      %c0_16 = arith.constant 0 : index
      %c0_17 = arith.constant 0 : index
      %24 = vector.load %arg2[%c0_16, %c0_17] : memref<64x256xbf16, #tpu.memory_space<vmem>>, vector<64x256xbf16>
      %cst_18 = arith.constant dense<0.000000e+00> : vector<8x256xf32>
      %25 = tpu.matmul %23, %24, %cst_18 {dimension_numbers = #tpu.dot_dimension_numbers<[1], [0], [0], [1], [0, 0, 1, 1], [], []>} : vector<8x64xbf16>, vector<64x256xbf16>, vector<8x256xf32> -> vector<8x256xf32>
      %c0_19 = arith.constant 0 : index
      %c0_20 = arith.constant 0 : index
      %26 = vector.load %arg3[%c0_19, %c0_20] : memref<1x256xf32, #tpu.memory_space<vmem>>, vector<1x256xf32>
      %27 = vector.broadcast %26 : vector<1x256xf32> to vector<8x256xf32>
      %28 = arith.addf %25, %27 : vector<8x256xf32>
      %cst_21 = arith.constant 0.000000e+00 : f32
      %29 = vector.broadcast %cst_21 : f32 to vector<8x256xf32>
      %30 = arith.maximumf %28, %29 : vector<8x256xf32>
      %31 = arith.truncf %30 : vector<8x256xf32> to vector<8x256xbf16>
      %c0_22 = arith.constant 0 : index
      %c0_23 = arith.constant 0 : index
      %32 = vector.load %arg9[%c0_22, %c0_23] : memref<8x256xbf16, #tpu.memory_space<vmem>>, vector<8x256xbf16>
      tpu.vector_store %arg9[%c0_22, %c0_23], %31 {strides = array<i32>} : memref<8x256xbf16, #tpu.memory_space<vmem>>, vector<8x256xbf16>,
      %c0_24 = arith.constant 0 : index
      %c0_25 = arith.constant 0 : index
      %33 = vector.load %arg6[%c0_24, %c0_25] : memref<256x128xbf16, #tpu.memory_space<vmem>>, vector<256x128xbf16>
      %cst_26 = arith.constant dense<0.000000e+00> : vector<8x128xf32>
      %34 = tpu.matmul %31, %33, %cst_26 {dimension_numbers = #tpu.dot_dimension_numbers<[1], [0], [0], [1], [0, 0, 1, 1], [], []>} : vector<8x256xbf16>, vector<256x128xbf16>, vector<8x128xf32> -> vector<8x128xf32>
      %c0_27 = arith.constant 0 : index
      %c0_28 = arith.constant 0 : index
      %35 = vector.load %arg7[%c0_27, %c0_28] : memref<1x128xf32, #tpu.memory_space<vmem>>, vector<1x128xf32>
      %36 = vector.broadcast %35 : vector<1x128xf32> to vector<8x128xf32>
      %37 = arith.addf %34, %36 : vector<8x128xf32>
      %c0_29 = arith.constant 0 : index
      %c0_30 = arith.constant 0 : index
      %38 = vector.load %arg10[%c0_29, %c0_30] : memref<8x128xf32, #tpu.memory_space<vmem>>, vector<8x128xf32>
      tpu.vector_store %arg10[%c0_29, %c0_30], %37 {strides = array<i32>} : memref<8x128xf32, #tpu.memory_space<vmem>>, vector<8x128xf32>,
    } else {
    }
    %c0 = arith.constant 0 : index
    %c0_1 = arith.constant 0 : index
    %3 = vector.load %arg9[%c0, %c0_1] : memref<8x256xbf16, #tpu.memory_space<vmem>>, vector<8x256xbf16>
    %c0_2 = arith.constant 0 : index
    %c0_3 = arith.constant 0 : index
    %4 = vector.load %arg4[%c0_2, %c0_3] : memref<256x128xbf16, #tpu.memory_space<vmem>>, vector<256x128xbf16>
    %cst = arith.constant dense<0.000000e+00> : vector<8x128xf32>
    %5 = tpu.matmul %3, %4, %cst {dimension_numbers = #tpu.dot_dimension_numbers<[1], [0], [0], [1], [0, 0, 1, 1], [], []>} : vector<8x256xbf16>, vector<256x128xbf16>, vector<8x128xf32> -> vector<8x128xf32>
    %c0_4 = arith.constant 0 : index
    %c0_5 = arith.constant 0 : index
    %6 = vector.load %arg5[%c0_4, %c0_5] : memref<1x128xf32, #tpu.memory_space<vmem>>, vector<1x128xf32>
    %7 = vector.broadcast %6 : vector<1x128xf32> to vector<8x128xf32>
    %8 = arith.addf %5, %7 : vector<8x128xf32>
    %cst_6 = arith.constant 0.000000e+00 : f32
    %9 = vector.broadcast %cst_6 : f32 to vector<8x128xf32>
    %10 = arith.maximumf %8, %9 : vector<8x128xf32>
    %c128_i32 = arith.constant 128 : i32
    %11 = arith.muli %arg0, %c128_i32 : i32
    %12 = tpu.assume_multiple %11, 128 : i32
    %13 = arith.index_cast %12 : i32 to index
    %c0_7 = arith.constant 0 : index
    %14 = vector.load %arg6[%13, %c0_7] : memref<256x128xbf16, #tpu.memory_space<vmem>>, vector<128x128xbf16>
    %c0_8 = arith.constant 0 : index
    %c0_9 = arith.constant 0 : index
    %15 = vector.load %arg10[%c0_8, %c0_9] : memref<8x128xf32, #tpu.memory_space<vmem>>, vector<8x128xf32>
    %16 = arith.truncf %10 : vector<8x128xf32> to vector<8x128xbf16>
    %cst_10 = arith.constant dense<0.000000e+00> : vector<8x128xf32>
    %17 = tpu.matmul %16, %14, %cst_10 {dimension_numbers = #tpu.dot_dimension_numbers<[1], [0], [0], [1], [0, 0, 1, 1], [], []>} : vector<8x128xbf16>, vector<128x128xbf16>, vector<8x128xf32> -> vector<8x128xf32>
    %18 = arith.addf %15, %17 : vector<8x128xf32>
    %c0_11 = arith.constant 0 : index
    %c0_12 = arith.constant 0 : index
    %19 = vector.load %arg10[%c0_11, %c0_12] : memref<8x128xf32, #tpu.memory_space<vmem>>, vector<8x128xf32>
    tpu.vector_store %arg10[%c0_11, %c0_12], %18 {strides = array<i32>} : memref<8x128xf32, #tpu.memory_space<vmem>>, vector<8x128xf32>,
    %c1_i32 = arith.constant 1 : i32
    %20 = arith.cmpi eq, %arg0, %c1_i32 : i32
    %21 = arith.extui %20 : i1 to i32
    %c0_i32_13 = arith.constant 0 : i32
    %22 = arith.cmpi ne, %21, %c0_i32_13 : i32
    scf.if %22 {
      %c0_14 = arith.constant 0 : index
      %c0_15 = arith.constant 0 : index
      %23 = vector.load %arg10[%c0_14, %c0_15] : memref<8x128xf32, #tpu.memory_space<vmem>>, vector<8x128xf32>
      %24 = math.tanh %23 : vector<8x128xf32>
      %cst_16 = arith.constant 2.000000e+00 : f32
      %25 = vector.broadcast %cst_16 : f32 to vector<8x128xf32>
      %26 = arith.mulf %25, %24 : vector<8x128xf32>
      %c0_17 = arith.constant 0 : index
      %c0_18 = arith.constant 0 : index
      %27 = vector.load %arg8[%c0_17, %c0_18] : memref<8x128xf32, #tpu.memory_space<vmem>>, vector<8x128xf32>
      tpu.vector_store %arg8[%c0_17, %c0_18], %26 {strides = array<i32>} : memref<8x128xf32, #tpu.memory_space<vmem>>, vector<8x128xf32>,
    } else {
    }
    return
  }
  func.func @transform_0(%arg0: i32) -> (i32, i32) {
    %c0_i32 = arith.constant 0 : i32
    %c0_i32_0 = arith.constant 0 : i32
    %c0_i32_1 = arith.constant 0 : i32
    return %c0_i32, %c0_i32_0 : i32, i32
  }
  func.func @transform_1(%arg0: i32) -> (i32, i32) {
    %c0_i32 = arith.constant 0 : i32
    %c0_i32_0 = arith.constant 0 : i32
    %c0_i32_1 = arith.constant 0 : i32
    return %c0_i32, %c0_i32_0 : i32, i32
  }
  func.func @transform_2(%arg0: i32) -> (i32, i32) {
    %c0_i32 = arith.constant 0 : i32
    %c0_i32_0 = arith.constant 0 : i32
    %c0_i32_1 = arith.constant 0 : i32
    return %c0_i32, %c0_i32_0 : i32, i32
  }
  func.func @transform_3(%arg0: i32) -> (i32, i32) {
    %c0_i32 = arith.constant 0 : i32
    %c0_i32_0 = arith.constant 0 : i32
    return %c0_i32, %arg0 : i32, i32
  }
  func.func @transform_4(%arg0: i32) -> (i32, i32) {
    %c0_i32 = arith.constant 0 : i32
    %c0_i32_0 = arith.constant 0 : i32
    return %c0_i32, %arg0 : i32, i32
  }
  func.func @transform_5(%arg0: i32) -> (i32, i32) {
    %c0_i32 = arith.constant 0 : i32
    %c0_i32_0 = arith.constant 0 : i32
    %c0_i32_1 = arith.constant 0 : i32
    return %c0_i32, %c0_i32_0 : i32, i32
  }
  func.func @transform_6(%arg0: i32) -> (i32, i32) {
    %c0_i32 = arith.constant 0 : i32
    %c0_i32_0 = arith.constant 0 : i32
    %c0_i32_1 = arith.constant 0 : i32
    return %c0_i32, %c0_i32_0 : i32, i32
  }
  func.func @transform_7(%arg0: i32) -> (i32, i32) {
    %c0_i32 = arith.constant 0 : i32
    %c0_i32_0 = arith.constant 0 : i32
    %c0_i32_1 = arith.constant 0 : i32
    return %c0_i32, %c0_i32_0 : i32, i32
  }
}

</mosaic_0001>

<bundles_post_ra>
// kernel: tpu_custom_call.1
= control target key start
LH: loop header
LB: loop body
LE: loop exit
PB: predicated region body
PF: predicated region fallthrough
CT: control target
= control target key end

     0   :  { %s1828_s0 = inlined_call_operand.hbm [shape: bf16[8,64], index: 0, kind: input, shape index: {}]   ;;  %s1829_s1 = inlined_call_operand.hbm [shape: bf16[64,256], index: 1, kind: input, shape index: {}]   ;;  %s1830_s2 = inlined_call_operand.hbm [shape: f32[1,256], index: 2, kind: input, shape index: {}]   ;;  %s1831_s3 = inlined_call_operand.hbm [shape: bf16[256,256], index: 3, kind: input, shape index: {}]   ;;  %s1832_s4 = inlined_call_operand.vmem [shape: f32[1,256], index: 4, kind: input, shape index: {}]   ;;  %s1833_s5 = inlined_call_operand.hbm [shape: bf16[256,128], index: 5, kind: input, shape index: {}]   ;;  %s1834_s6 = inlined_call_operand.vmem [shape: f32[1,128], index: 6, kind: input, shape index: {}]   ;;  %s1835_s7 = inlined_call_operand.hbm [shape: f32[8,128], index: 7, kind: output, shape index: {}]  }
   0x1   :  { %1839 = sst [smem:[#allocation19_spill]] %s1829_s1 }
   0x2   :  { %1840 = sst [smem:[#allocation20_spill]] %s1833_s5 }
   0x3   :  { %12 = vsyncpa [#allocation5], 0 }
   0x4   :  { %13 = vsyncpa [#allocation8], 0 }
   0x5   :  { %14 = vsyncpa [#allocation11], 0 }
   0x6   :  { %16 = vsyncpa [#allocation11 + $0x1], 0 }
   0x7   :  { %17 = vsyncpa [#allocation6], 0  ;;  %s1632_s24 = smov 0   ;;  %s1634_s25 = smov 0  }
   0x8   :  { %s1636_s26 = smov 0   ;;  %s1638_s27 = smov 0  }
   0x9 LB: > { %s1651_s28 = sadd.s32 4294967295, %s1581_s27   ;;  %s1654_s29 = sadd.s32 1, %s1581_s27   ;;  %s1581_s27 = sphi %s1638_s27, %s1854_s27   ;;  %s1577_s26 = sphi %s1636_s26, %s1853_s26   ;;  %s1573_s25 = sphi %s1634_s25, %s1852_s25   ;;  %s1569_s24 = sphi %s1632_s24, %s1851_s24  }
   0xa   : > { %s90_s30 = ssub.s32 %s1581_s27, %s1654_s29  ;;  %s93_s8 = sadd.s32 1, %s1577_s26 }
   0xb   : > { %p91_p0 = scmp.eq.s32.totalorder %s90_s30, 0  ;;  %p100_p1 = scmp.ne.s32.totalorder %s1577_s26, %s1573_s25 }
   0xc   : > { %p101_p2 = scmp.eq.s32.totalorder %s1581_s27, 0  ;;  %p106_p3 = scmp.ne.s32.totalorder %s1573_s25, %s1569_s24 }
   0xd   : > { %s1664_s9 = scalar_select %p91_p0, %s1577_s26, %s93_s8  }
   0xe   : > { %p1666_p4 = por %p101_p2, %p100_p1  ;;  %p107_p5 = scmp.eq.s32.totalorder %s1651_s28, 0 }
   0xf   : > { %p994_p6 = scmp.ge.s32.totalorder %s1581_s27, 1  ;;  %p206_p7 = scmp.lt.s32.totalorder %s1581_s27, 3 }
  0x10   : > { %p1675_p8 = por %p107_p5, %p106_p3  ;;  %p995_p9 = scmp.ne.s32.totalorder %s1651_s28, 0 }
  0x11   : > { %p1680_p10 = pnand %p994_p6, %p206_p7  ;;  %s1844_s1 = sld [smem:[#allocation19_spill]] }
  0x12   : > { %s1583_s16 = smov [#allocation7]   ;;  %p1301_p13 = scmp.lt.s32.totalorder %s1581_s27, 2 }
  0x13   : > { %p1280_p11 = pneg %p1680_p10  ;;  %s231_s17 = sshll.u32 %s1583_s16, 4  ;;  %s232_s17 = int_to_ptr.vmem [resolvable:$true] %s231_s17 }
  0x14   : > { %s1846_s5 = sld [smem:[#allocation20_spill]]  ;;  %s1836_s22 = smov 128  }
  0x15   : > { %p1691_p12 = pnand %p1280_p11, %p107_p5  ;;  %s1585_s23 = smov 8  }
  0x16   : > { %p1705_p0 = pnand %p1301_p13, %p1666_p4  ;;  %s1586_s30 = smov [#allocation12]  }
  0x17   : > { %s229_s15 = sshll.u32 %s1844_s1, 4  ;;  %s257_s8 = sshll.u32 %s1586_s30, 4  ;;  %s230_s15 = int_to_ptr.hbm [resolvable:$true] %s229_s15  ;;  %s258_s8 = int_to_ptr.vmem [resolvable:$true] %s257_s8 }
  0x18   : > { %1286 = dma.hbm_to_vmem [thread:$0]  (!%p1691_p12), %s230_s15, 1024, %s232_s17, [#allocation8], %s1836_s22, %s1836_s22, %s1585_s23  }
  0x19   : > { %s1837_s13 = smov 64   ;;  %s1838_s14 = smov 4  }
  0x1a   : > { %s255_s21 = sshll.u32 %s1846_s5, 4  ;;  %s218_s16 = sshll.u32 %s1828_s0, 4  ;;  %s256_s21 = int_to_ptr.hbm [resolvable:$true] %s255_s21  ;;  %s219_s16 = int_to_ptr.hbm [resolvable:$true] %s218_s16 }
  0x1b   : > { %1292 = dma.hbm_to_vmem [thread:$0]  (!%p1691_p12), %s256_s21, 2048, %s258_s8, [#allocation11], %s1837_s13, %s1837_s13, %s1838_s14  }
  0x1c   : > { %s1589_s17 = smov [#allocation4]   ;;  %s244_s30 = sshll.u32 %s1830_s2, 4  ;;  %s245_s30 = int_to_ptr.hbm [resolvable:$true] %s244_s30 }
  0x1d   : > { %s220_s19 = sshll.u32 %s1589_s17, 4  ;;  %s1590_s22 = smov [#allocation9]   ;;  %s221_s19 = int_to_ptr.vmem [resolvable:$true] %s220_s19 }
  0x1e   : > { %1283 = dma.hbm_to_vmem [thread:$0]  (!%p1691_p12), %s219_s16, 64, %s221_s19, [#allocation5]  }
  0x1f   : > { %s246_s1 = sshll.u32 %s1590_s22, 4  ;;  %s274_s5 = sand.u32 1, %s1581_s27   ;;  %s247_s1 = int_to_ptr.vmem [resolvable:$true] %s246_s1 }
  0x20   : > { %1289 = dma.hbm_to_vmem [thread:$0]  (!%p1691_p12), %s245_s30, 32, %s247_s1, [#allocation8]  }
  0x21   : > { %s276_s21 = sand.u32 1, %s1577_s26   ;;  %s1001_s8 = sshll.u32 %s1581_s27, 2 }
  0x22   : > { %s1000_s10 = sshll.u32 %s276_s21, 7  ;;  %s282_s13 = scalar_lea.hbm %s1831_s3, %s1001_s8 }
  0x23   : > { %s283_s14 = sshll.u32 %s282_s13, 4  ;;  %s278_s20 = scalar_lea.vmem [#allocation10], %s1000_s10  ;;  %s284_s14 = int_to_ptr.hbm [resolvable:$true] %s283_s14 }
  0x24   : > { %s285_s23 = sshll.u32 %s278_s20, 4  ;;  %s275_s16 = scalar_lea.sflag [#allocation11], %s274_s5  ;;  %s286_s23 = int_to_ptr.vmem [resolvable:$true] %s285_s23 }
  0x25   : > { %s1473_s19 = sshra.s32 %s284_s14, 4  ;;  %p1477_p2 = pneg %p1705_p0  ;;  %s1474_s19 = int_to_ptr.hbm [resolvable:$true] %s1473_s19 }
  0x26   : > { %s1475_s22 = scalar_lea.hbm %s1474_s19, 128  ;;  %s1480_s18 = scalar_lea.hbm %s1831_s3, 256 }
  0x27   : > { %p1476_p1 = scmp.ne.s32.totalorder %s1474_s19, %s1475_s22  ;;  %p1481_p6 = scmp.lt.s32.totalorder %s1474_s19, %s1831_s3 }
  0x28   : > { %p1482_p7 = scmp.lt.s32.totalorder %s1480_s18, %s1475_s22 }
  0x29   : > { %p1478_p3 = pnand %p1477_p2, %p1476_p1 }
  0x2a   : > { %p1483_p11 = por %p1482_p7, %p1481_p6 }
  0x2b   : > { %p1479_p4 = pneg %p1478_p3 }
  0x2d   : > { %p1484_p12 = pnand %p1483_p11, %p1479_p4 }
  0x2f   : > { %1487 = shalt.err (!%p1484_p12)
}
  0x30   : > { %s1848_s5 = smov 4   ;;  %s1849_s13 = smov 64  }
  0x31   : > { %s1850_s8 = smov 128   ;;  %303 = sbr.rel (%p1680_p10) target bundleno = 686 (0x2ae), region = 48 }
  0x32   : > { %1296 = dma.hbm_to_vmem [thread:$0]  (!%p1705_p0), %s284_s14, 2048, %s286_s23, %s275_s16, %s1850_s8, %s1849_s13, %s1848_s5  }
  0x36   : > { %1548 = dma.done.wait (%p107_p5), [#allocation5], 64  }
  0x37   : > { %1550 = vsyncadd (%p107_p5), [#allocation5], 4294967232 }
  0x38   : > { %1552 = dma.done.wait (%p107_p5), [#allocation8], 1056  }
  0x39   : > { %1554 = vsyncadd (%p107_p5), [#allocation8], 4294966240  ;;  %s320_s24 = sand.u32 1, %s1651_s28   ;;  %s322_s14 = sand.u32 1, %s1573_s25  }
  0x3a   : > { %s1006_s10 = sshll.u32 %s322_s14, 7  ;;  %s321_s12 = scalar_lea.sflag [#allocation11], %s320_s24 }
  0x3b   : > { %s1755_s15 = scalar_lea.vmem [#allocation10], %s1006_s10 }
  0x3c   : > { %1556 = dma.done.wait (%p1675_p8), %s321_s12, 2048  }
  0x3d   : > { %1558 = vsyncadd (%p1675_p8), %s321_s12, 4294965248 }
  0x3e   : > { %1560 = dma.done.wait (%p107_p5), [#allocation11], 2048  }
  0x3f   : > { %1562 = vsyncadd (%p107_p5), [#allocation11], 4294965248  ;;  %p359_p10 = scmp.lt.s32.totalorder %s1651_s28, 1  ;;  %366 = sbr.rel (%p995_p9) target bundleno = 363 (0x16b), region = 72 }
  0x41   : > { %s1767_s17 = scalar_select %p359_p10, %s1651_s28, 1 }
  0x43   : > { %s361_s16 = scalar_lea.vmem %s1832_s4, %s1767_s17 }
  0x44   : > { %v1035_v0 = vld [vmem:[#allocation7 + $0x30] sm:$0xf]  ;;  %v1217_v1 = vld [vmem:[#allocation7 + $0x34] sm:$0xf0]  ;;  %v1216_v2 = vld [vmem:[#allocation7 + $0x34] sm:$0xf] }
  0x45   : > { %v1036_v3 = vor.u32 %v1217_v1, %v1035_v0  ;;  %v1037_v4 = vld [vmem:[#allocation7 + $0x38] sm:$0xf0]  ;;  %v1027_v5 = vld [vmem:[#allocation7 + $0x20] sm:$0xf]  ;;  %v1215_v6 = vld [vmem:[#allocation7 + $0x24] sm:$0xf0] }
  0x46   : > { %v1040_v7 = vor.u32 %v1216_v2, %v1037_v4  ;;  %v1214_v8 = vld [vmem:[#allocation7 + $0x24] sm:$0xf]  ;;  %v1029_v9 = vld [vmem:[#allocation7 + $0x28] sm:$0xf0]  ;;  %v1028_v10 = vor.u32 %v1215_v6, %v1027_v5  ;;  %v1019_v12 = vld [vmem:[#allocation7 + $0x10] sm:$0xf] }
  0x47   : > { %430 = vmatpush.bf16.msra.mxu0 %v1036_v3  ;;  %v1032_v11 = vor.u32 %v1214_v8, %v1029_v9  ;;  %v1213_v13 = vld [vmem:[#allocation7 + $0x14] sm:$0xf0]  ;;  %v1212_v14 = vld [vmem:[#allocation7 + $0x14] sm:$0xf]  ;;  %v1021_v15 = vld [vmem:[#allocation7 + $0x18] sm:$0xf0] }
  0x48   : > { %443 = vmatpush.bf16.msra.mxu1 %v1040_v7  ;;  %v1225_v16 = vld [vmem:[#allocation12 + $0x38] sm:$0xff]  ;;  %v1020_v18 = vor.u32 %v1213_v13, %v1019_v12  ;;  %v1224_v19 = vld [vmem:[#allocation12 + $0x30] sm:$0xff]  ;;  %v1024_v20 = vor.u32 %v1212_v14, %v1021_v15  ;;  %v1211_v22 = vld [vmem:[#allocation7 + $0x4] sm:$0xf0]  ;;  %vm422_vm0 = vcmask 523264  }
  0x49   : > { %v1233_v17 = vld [vmem:[#allocation12 + $0x78] sm:$0xff]  ;;  %595 = vmatpush.bf16.msra.mxu2 %v1225_v16  ;;  %v1232_v23 = vld [vmem:[#allocation12 + $0x70] sm:$0xff]  ;;  %v1210_v24 = vld [vmem:[#allocation7 + $0x4] sm:$0xf] }
  0x4a   : > { %v1011_v21 = vld [vmem:[#allocation7] sm:$0xf]  ;;  %608 = vmatpush.bf16.msra.mxu3 %v1233_v17  ;;  %v1013_v25 = vld [vmem:[#allocation7 + $0x8] sm:$0xf0]  ;;  %v367_v30 = vld [vmem:[#allocation4] sm:$0xf] }
  0x4b   : > { %431 = vmatpush.bf16.msra.mxu0 %v1028_v10  ;;  %v1012_v26 = vor.u32 %v1211_v22, %v1011_v21  ;;  %v1223_v27 = vld [vmem:[#allocation12 + $0x28] sm:$0xff]  ;;  %v1016_v28 = vor.u32 %v1210_v24, %v1013_v25  ;;  %v1222_v31 = vld [vmem:[#allocation12 + $0x20] sm:$0xff]  ;;  %v1221_v33 = vld [vmem:[#allocation12 + $0x18] sm:$0xff] }
  0x4c   : > { %444 = vmatpush.bf16.msra.mxu1 %v1032_v11  ;;  %v1231_v29 = vld [vmem:[#allocation12 + $0x68] sm:$0xff]  ;;  %v1230_v32 = vld [vmem:[#allocation12 + $0x60] sm:$0xff]  ;;  %v1229_v34 = vld [vmem:[#allocation12 + $0x58] sm:$0xff] }
  0x4d   : > { %596 = vmatpush.bf16.msra.mxu2 %v1224_v19  ;;  %v1220_v35 = vld [vmem:[#allocation12 + $0x10] sm:$0xff]  ;;  %v1219_v37 = vld [vmem:[#allocation12 + $0x8] sm:$0xff]  ;;  %v1218_v39 = vld [vmem:[#allocation12] sm:$0xff] }
  0x4e   : > { %609 = vmatpush.bf16.msra.mxu3 %v1232_v23  ;;  %v1228_v36 = vld [vmem:[#allocation12 + $0x50] sm:$0xff]  ;;  %v1227_v38 = vld [vmem:[#allocation12 + $0x48] sm:$0xff]  ;;  %v1226_v40 = vld [vmem:[#allocation12 + $0x40] sm:$0xff] }
  0x4f   : > { %432 = vmatpush.bf16.msra.mxu0 %v1020_v18  ;;  %v376_v41 = vld [vmem:[#allocation9] sm:$0x3]  ;;  %v1349_v57 = vld [vmem:[%s1834_s6] ss:$0 sm:$0xff] }
  0x50   : > { %445 = vmatpush.bf16.msra.mxu1 %v1024_v20  ;;  %v378_v42 = vperm.slane %v376_v41, 0  ;;  %v379_v43 = vperm.slane %v376_v41, 1 }
  0x51   : > { %597 = vmatpush.bf16.msra.mxu2 %v1223_v27 }
  0x52   : > { %610 = vmatpush.bf16.msra.mxu3 %v1231_v29 }
  0x53   : > { %433 = vmatpush.bf16.msra.mxu0 %v1012_v26 }
  0x54   : > { %446 = vmatpush.bf16.msra.mxu1 %v1016_v28 }
  0x55   : > { %598 = vmatpush.bf16.msra.mxu2 %v1222_v31 }
  0x56   : > { %1041 = vmatmul.msk.bf16.vlgmr.msra.gmra.mxu0 %vm422_vm0, %v367_v30  ;;  %611 = vmatpush.bf16.msra.mxu3 %v1230_v32 }
  0x57   : > { %1042 = vmatmul.msk.bf16.vlgmr.msra.gmra.mxu1 %vm422_vm0, %v367_v30 }
  0x59   : > { %599 = vmatpush.bf16.msra.mxu2 %v1221_v33 }
  0x5a   : > { %612 = vmatpush.bf16.msra.mxu3 %v1229_v34 }
  0x5d   : > { %600 = vmatpush.bf16.msra.mxu2 %v1220_v35 }
  0x5e   : > { %613 = vmatpush.bf16.msra.mxu3 %v1228_v36 }
  0x61   : > { %601 = vmatpush.bf16.msra.mxu2 %v1219_v37 }
  0x62   : > { %614 = vmatpush.bf16.msra.mxu3 %v1227_v38 }
  0x65   : > { %602 = vmatpush.bf16.msra.mxu2 %v1218_v39 }
  0x66   : > { %615 = vmatpush.bf16.msra.mxu3 %v1226_v40 }
  0xd3   : > { %v435_v44 = vpop.f32.mrf.mxu0 }
  0xd4   : > { %v436_v45 = vadd.f32 %v435_v44, %v378_v42  ;;  %v448_v46 = vpop.f32.mrf.mxu1 }
  0xd5   : > { %v449_v47 = vadd.f32 %v448_v46, %v379_v43 }
  0xd6   : > { %v452_v48 = vmax.f32 %v436_v45, 0.0 }
  0xd7   : > { %v453_v49 = vmax.f32 %v449_v47, 0.0 }
  0xd9   : > { %v454_v50 = vpack.c.bf16 %v453_v49, %v452_v48 }
  0xdb   : > { %455 = vst [vmem:[#allocation2] sm:$0xff] %v454_v50  ;;  %v437_v51 = vpop.f32.mrf.mxu0  ;;  %v493_v52 = vunpack.c.l.b16 %v454_v50  ;;  %v494_v53 = vunpack.c.h.b16 %v454_v50 }
  0xdc   : > { %v450_v54 = vpop.f32.mrf.mxu1 }
  0xdd   : > { %v495_v55 = vpack.c.b16 %v493_v52, %v493_v52  ;;  %v496_v56 = vpack.c.b16 %v494_v53, %v494_v53 }
  0xdf   : > { %603 = vmatmul.bf16.vlgmr.msra.gmra.mxu2 %v495_v55  ;;  %616 = vmatmul.bf16.vlgmr.msra.gmra.mxu3 %v496_v56 }
 0x162   : > { %v604_v58 = vpop.f32.mrf.mxu2  ;;  %v617_v59 = vpop.f32.mrf.mxu3 }
 0x163   : > { %v605_v60 = vadd.f32 %v1349_v57, %v604_v58 }
 0x165   : > { %v618_v61 = vadd.f32 %v617_v59, %v605_v60 }
 0x167   : > { %621 = vst [vmem:[#allocation3] sm:$0xff] %v618_v61 }
 0x16a   : > { %v606_v62 = vpop.f32.mrf.mxu2  ;;  %v619_v63 = vpop.f32.mrf.mxu3 }
 0x16b PF: > { %v1241_v0 = vld [vmem:[%s1755_s15 + $0x38] sm:$0xff]  ;;  %s1171_s22 = sshll.u32 %s1651_s28, 7  ;;  %v1240_v2 = vld [vmem:[%s1755_s15 + $0x30] sm:$0xff]  ;;  %v1239_v5 = vld [vmem:[%s1755_s15 + $0x28] sm:$0xff]  ;;  %p1205_p5 = scmp.ne.s32.totalorder %s1651_s28, 1 }
 0x16c   : > { %v1249_v1 = vld [vmem:[%s1755_s15 + $0x78] sm:$0xff]  ;;  %s790_s1 = sshra.s32 %s1171_s22, 3  ;;  %762 = vmatpush.bf16.msra.mxu0 %v1241_v0  ;;  %v1248_v3 = vld [vmem:[%s1755_s15 + $0x70] sm:$0xff]  ;;  %v1247_v6 = vld [vmem:[%s1755_s15 + $0x68] sm:$0xff] }
 0x16d   : > { %775 = vmatpush.bf16.msra.mxu1 %v1249_v1  ;;  %s1172_s27 = sshll.u32 %s790_s1, 2  ;;  %v1238_v8 = vld [vmem:[%s1755_s15 + $0x20] sm:$0xff]  ;;  %v1237_v11 = vld [vmem:[%s1755_s15 + $0x18] sm:$0xff]  ;;  %v1236_v14 = vld [vmem:[%s1755_s15 + $0x10] sm:$0xff] }
 0x16e   : > { %s1783_s18 = scalar_lea.vmem [#allocation12], %s1172_s27  ;;  %v1246_v9 = vld [vmem:[%s1755_s15 + $0x60] sm:$0xff]  ;;  %v1245_v12 = vld [vmem:[%s1755_s15 + $0x58] sm:$0xff]  ;;  %v1244_v15 = vld [vmem:[%s1755_s15 + $0x50] sm:$0xff] }
 0x16f   : > { %v1257_v4 = vld [vmem:[%s1783_s18 + $0x38] sm:$0xff]  ;;  %v1256_v7 = vld [vmem:[%s1783_s18 + $0x30] sm:$0xff]  ;;  %v1255_v10 = vld [vmem:[%s1783_s18 + $0x28] sm:$0xff] }
 0x170   : > { %763 = vmatpush.bf16.msra.mxu0 %v1240_v2  ;;  %860 = vmatpush.bf16.msra.mxu2 %v1257_v4  ;;  %v1254_v13 = vld [vmem:[%s1783_s18 + $0x20] sm:$0xff]  ;;  %v1253_v16 = vld [vmem:[%s1783_s18 + $0x18] sm:$0xff]  ;;  %v1252_v20 = vld [vmem:[%s1783_s18 + $0x10] sm:$0xff] }
 0x171   : > { %776 = vmatpush.bf16.msra.mxu1 %v1248_v3  ;;  %v1235_v17 = vld [vmem:[%s1755_s15 + $0x8] sm:$0xff]  ;;  %v1234_v23 = vld [vmem:[%s1755_s15] sm:$0xff]  ;;  %v1251_v27 = vld [vmem:[%s1783_s18 + $0x8] sm:$0xff] }
 0x172   : > { %v1243_v18 = vld [vmem:[%s1755_s15 + $0x48] sm:$0xff]  ;;  %v1242_v24 = vld [vmem:[%s1755_s15 + $0x40] sm:$0xff]  ;;  %v810_v38 = vld [vmem:[#allocation3] sm:$0xff] }
 0x173   : > { %v622_v19 = vld [vmem:[#allocation2] sm:$0xff] }
 0x174   : > { %764 = vmatpush.bf16.msra.mxu0 %v1239_v5  ;;  %861 = vmatpush.bf16.msra.mxu2 %v1256_v7  ;;  %v660_v21 = vunpack.c.l.b16 %v622_v19  ;;  %v661_v22 = vunpack.c.h.b16 %v622_v19  ;;  %v1250_v28 = vld [vmem:[%s1783_s18] sm:$0xff] }
 0x175   : > { %777 = vmatpush.bf16.msra.mxu1 %v1247_v6  ;;  %v1350_v29 = vld [vmem:[%s361_s16] ss:$0 sm:$0xff] }
 0x176   : > { %v662_v25 = vpack.c.b16 %v660_v21, %v660_v21  ;;  %v663_v26 = vpack.c.b16 %v661_v22, %v661_v22 }
 0x178   : > { %765 = vmatpush.bf16.msra.mxu0 %v1238_v8  ;;  %862 = vmatpush.bf16.msra.mxu2 %v1255_v10 }
 0x179   : > { %778 = vmatpush.bf16.msra.mxu1 %v1246_v9 }
 0x17c   : > { %766 = vmatpush.bf16.msra.mxu0 %v1237_v11  ;;  %863 = vmatpush.bf16.msra.mxu2 %v1254_v13 }
 0x17d   : > { %779 = vmatpush.bf16.msra.mxu1 %v1245_v12 }
 0x180   : > { %767 = vmatpush.bf16.msra.mxu0 %v1236_v14  ;;  %864 = vmatpush.bf16.msra.mxu2 %v1253_v16 }
 0x181   : > { %780 = vmatpush.bf16.msra.mxu1 %v1244_v15 }
 0x184   : > { %768 = vmatpush.bf16.msra.mxu0 %v1235_v17  ;;  %865 = vmatpush.bf16.msra.mxu2 %v1252_v20 }
 0x185   : > { %781 = vmatpush.bf16.msra.mxu1 %v1243_v18 }
 0x188   : > { %769 = vmatpush.bf16.msra.mxu0 %v1234_v23  ;;  %866 = vmatpush.bf16.msra.mxu2 %v1251_v27 }
 0x189   : > { %782 = vmatpush.bf16.msra.mxu1 %v1242_v24 }
 0x18b   : > { %770 = vmatmul.bf16.vlgmr.msra.gmra.mxu0 %v662_v25 }
 0x18c   : > { %783 = vmatmul.bf16.vlgmr.msra.gmra.mxu1 %v663_v26  ;;  %867 = vmatpush.bf16.msra.mxu2 %v1250_v28 }
 0x208   : > { %v771_v30 = vpop.f32.mrf.mxu0 }
 0x209   : > { %v784_v31 = vpop.f32.mrf.mxu1  ;;  %v772_v32 = vadd.f32 %v1350_v29, %v771_v30 }
 0x20b   : > { %v785_v33 = vadd.f32 %v784_v31, %v772_v32 }
 0x20d   : > { %v788_v34 = vmax.f32 %v785_v33, 0.0 }
 0x20f   : > { %v811_v35 = vpack.c.bf16 %v788_v34, %v788_v34 }
 0x210   : > { %v773_v36 = vpop.f32.mrf.mxu0 }
 0x211   : > { %v786_v37 = vpop.f32.mrf.mxu1  ;;  %868 = vmatmul.bf16.vlgmr.msra.gmra.mxu2 %v811_v35 }
 0x294   : > { %v869_v39 = vpop.f32.mrf.mxu2 }
 0x295   : > { %v873_v40 = vadd.f32 %v869_v39, %v810_v38 }
 0x297   : > { %874 = vst [vmem:[#allocation3] sm:$0xff] %v873_v40 }
 0x298   : > { %878 = sbr.rel (%p1205_p5) target bundleno = 681 (0x2a9), region = 76 }
 0x29c   : > { %v871_v41 = vpop.f32.mrf.mxu2 }
 0x29e   : > { %v879_v42 = vld [vmem:[#allocation3] sm:$0xff] }
 0x29f   : > { %1351 = vtanh.f32 %v879_v42 }
 0x2a5   : > { %v1352_v43 = vpop.eup %1351 }
 0x2a6   : > { %v881_v44 = vmul.f32 2.0, %v1352_v43 }
 0x2a8   : > { %882 = vst [vmem:[#allocation13] sm:$0xff] %v881_v44 }
 0x2a9 PF: > { %p1306_p8 = scmp.eq.s32.totalorder %s1651_s28, 1  ;;  %s1591_s5 = smov [#allocation13]  }
 0x2aa   : > { %s889_s13 = sshll.u32 %s1591_s5, 4  ;;  %s891_s14 = sshll.u32 %s1835_s7, 4  ;;  %s890_s13 = int_to_ptr.vmem [resolvable:$true] %s889_s13  ;;  %s892_s14 = int_to_ptr.hbm [resolvable:$true] %s891_s14 }
 0x2ab   : > { %1277 = dma.vmem_to_hbm [thread:$0]  (%p1306_p8), %s890_s13, 128, %s892_s14, [#allocation6]  }
 0x2ac   : > { %1564 = dma.done.wait (%p1306_p8), [#allocation6], 128  }
 0x2ad   : > { %1566 = vsyncadd (%p1306_p8), [#allocation6], 4294967168 }
 0x2ae PF: > { %p20_p9 = scmp.ge.s32.totalorder %s1654_s29, 4   ;;  %s1851_s24 = smov %s1573_s25 }
 0x2af   : > { %s1852_s25 = smov %s1577_s26  ;;  %s1853_s26 = smov %s1664_s9 }
 0x2b0   : > { %s1854_s27 = smov %s1654_s29  ;;  %22 = sbr.rel (!%p20_p9) target bundleno = 9 (0x9), region = 114 }
 0x2b5   :  { %905 = vsyncpa [#allocation5], 1 }
 0x2b6   :  { %907 = vsyncpa [#allocation5 + $0x1], 1 }
 0x2b7   :  { %908 = vsyncpa [#allocation8], 1 }
 0x2b8   :  { %909 = vsyncpa [#allocation11], 1 }
 0x2b9   :  { %911 = vsyncpa [#allocation11 + $0x1], 1 }
 0x2ba   :  { %912 = vsyncpa [#allocation6], 1 }
 0x2bb   :  { %914 = vsyncpa [#allocation6 + $0x1], 1 }

</bundles_post_ra>
